<compile_context>
chip_gen: v7x
topology: tpu7x:2x2x1
jax: 0.10.0
libtpu: 0.0.40
codegen_flags: <defaults>
</compile_context>

<pallas_src>
import jax
import jax.numpy as jnp
from jax.experimental import pallas as pl
from jax.experimental.pallas import tpu as pltpu


def _round_up(x, m):
    return (x + m - 1) // m * m


def _vmem_capacity_bytes():
    try:
        return int(pltpu.get_tpu_info().vmem_capacity_bytes)
    except Exception:
        return 64 * 1024 * 1024          # conservative: v7x per-TC VMEM


def _vmem_bytes(tb, tc, E, w_bufs):
    return (2 * tb * E * 4               # x in (f32), double buffered
            + w_bufs * E * tc * 2        # weight in (bf16)
            + 2 * tb * E * 4             # emb out (f32)
            + 2 * tb * tc * 4            # logits out (f32)
            + 2 * tb * 4                 # lse out (f32)
            + tb * E * 2                 # xn scratch (bf16)
            + 2 * tb * 4)                # m, l scratch (f32)


def plan_tiles(B, E, C, *, block_b=None, block_c=None):
    """Pick (tb, b_pad, tc, c_pad, w_bufs, vmem_limit) for the kernel."""
    capacity = _vmem_capacity_bytes()
    budget = (capacity * 3) // 4          # ~96 MiB on v5e/v6e, ~48 MiB on v7x

    if block_b is None:
        block_b = 256 if capacity >= (100 << 20) else 128
    tb = min(block_b, _round_up(B, 8))
    # >=2 batch tiles whenever B allows, so the "parallel" axis can shard
    # across both TensorCores on megacore parts (v7x).
    if B >= 16 and _round_up(B, tb) // tb < 2:
        tb = _round_up((B + 1) // 2, 8)
    b_pad = _round_up(B, tb)

    c_pad_min = _round_up(C, 128)
    w_bufs = 2
    if block_c is not None:
        tc = min(_round_up(block_c, 128), c_pad_min)
    elif _vmem_bytes(tb, c_pad_min, E, 2) <= budget:
        tc = c_pad_min                    # single class tile: weight stays resident
    else:
        w_bufs = 3                        # deeper weight pipeline (v5e HBM stream)
        tc = 4096
        while tc > 256 and _vmem_bytes(tb, tc, E, w_bufs) > budget:
            tc //= 2
        tc = min(tc, c_pad_min)
    c_pad = _round_up(C, tc)
    if c_pad // tc < 3:
        w_bufs = 2

    est = _vmem_bytes(tb, tc, E, w_bufs)
    vmem_limit = int(min(budget, max(16 * 1024 * 1024, 2 * est)))
    return tb, b_pad, tc, c_pad, w_bufs, vmem_limit


def prepare_classifier_weight(weight, c_pad):
    """(C, E) f32 -> (E, c_pad) bf16, pre-transposed + padded.

    Parameter-only transform; cache the result across steps instead of paying
    a full C*E read/write in XLA before every kernel launch.
    """
    C = weight.shape[0]
    return jnp.pad(weight.astype(jnp.bfloat16).T, ((0, 0), (0, c_pad - C)))


def _make_kernel(tc, n_classes, c_pad):
    mask_classes = (c_pad != n_classes)

    def kernel(x_ref, wt_ref, emb_ref, logits_ref, lse_ref, xn_sc, m_sc, l_sc):
        k = pl.program_id(1)

        # ---- init (once per batch tile): normalize embeddings, reset carry ----
        @pl.when(k == 0)
        def _():
            x = x_ref[...].astype(jnp.float32)                 # (tb, E)
            sq = jnp.sum(x * x, axis=-1, keepdims=True)
            # F.normalize(p=2, eps=1e-12): x / max(||x||, 1e-12)
            inv = jax.lax.rsqrt(jnp.maximum(sq, 1e-24))
            x_n = x * inv
            emb_ref[...] = x_n.astype(emb_ref.dtype)
            xn_sc[...] = x_n.astype(xn_sc.dtype)               # bf16 MXU operand
            m_sc[...] = jnp.full_like(m_sc, -jnp.inf)
            l_sc[...] = jnp.zeros_like(l_sc)

        # ---- class-tile logits on the MXU (bf16 in, f32 accumulate) ----
        logits = jnp.dot(xn_sc[...], wt_ref[...],
                         preferred_element_type=jnp.float32)   # (tb, tc)
        logits_ref[...] = logits.astype(logits_ref.dtype)

        if mask_classes:
            # Padded-class mask as a (1, tc) additive bias row: a single
            # broadcast add over (tb, tc) instead of iota/cmp/where passes.
            col = k * tc + jax.lax.broadcasted_iota(jnp.int32, (1, tc), 1)
            bias = jnp.where(col < n_classes,
                             jnp.float32(0.0), jnp.float32(-jnp.inf))
            s = logits + bias
        else:
            s = logits

        # ---- online logsumexp across class tiles ----
        m_prev = m_sc[...]
        m_new = jnp.maximum(m_prev, jnp.max(s, axis=-1, keepdims=True))
        alpha = jnp.exp(m_prev - m_new)
        l_sc[...] = alpha * l_sc[...] + jnp.sum(jnp.exp(s - m_new),
                                                axis=-1, keepdims=True)
        m_sc[...] = m_new

        # ---- finalize: per-row logsumexp (NLL assembled outside the kernel) ----
        @pl.when(k == pl.num_programs(1) - 1)
        def _():
            lse_ref[...] = (m_sc[...] + jnp.log(l_sc[...])).astype(lse_ref.dtype)

    return kernel


def metric_learning_loss(inputs, weight, targets, n_classes, *,
                         block_b=None, block_c=None, prepared_weight=None):
    """Forward pass: returns (normalized embeddings, logits, mean CE loss).

    inputs:  (B, E) float32 embeddings
    weight:  (C, E) float32 classifier weight (or pass prepared_weight)
    targets: (B,)   int32 class labels, assumed in [0, n_classes)
    """
    B, E = inputs.shape
    C = weight.shape[0]
    assert C == n_classes

    tb, b_pad, tc, c_pad, w_bufs, vmem_limit = plan_tiles(
        B, E, C, block_b=block_b, block_c=block_c)

    x_p = jnp.pad(inputs.astype(jnp.float32), ((0, b_pad - B), (0, 0)))
    if prepared_weight is None:
        prepared_weight = prepare_classifier_weight(weight, c_pad)
    assert prepared_weight.shape == (E, c_pad)

    grid = (b_pad // tb, c_pad // tc)

    if w_bufs == 3:
        w_spec = pl.BlockSpec((E, tc), lambda i, k: (0, k),
                              pipeline_mode=pl.Buffered(3))
    else:
        w_spec = pl.BlockSpec((E, tc), lambda i, k: (0, k))

    kernel = _make_kernel(tc, C, c_pad)

    emb_p, logits_p, lse_p = pl.pallas_call(
        kernel,
        out_shape=(
            jax.ShapeDtypeStruct((b_pad, E), jnp.float32),      # normalized emb
            jax.ShapeDtypeStruct((b_pad, c_pad), jnp.float32),  # logits
            jax.ShapeDtypeStruct((b_pad, 1), jnp.float32),      # per-row logsumexp
        ),
        grid=grid,
        in_specs=[
            pl.BlockSpec((tb, E), lambda i, k: (i, 0)),
            w_spec,
        ],
        out_specs=(
            pl.BlockSpec((tb, E), lambda i, k: (i, 0)),
            pl.BlockSpec((tb, tc), lambda i, k: (i, k)),
            pl.BlockSpec((tb, 1), lambda i, k: (i, 0)),
        ),
        scratch_shapes=[
            pltpu.VMEM((tb, E), jnp.bfloat16),   # normalized x (MXU operand)
            pltpu.VMEM((tb, 1), jnp.float32),    # running max  m
            pltpu.VMEM((tb, 1), jnp.float32),    # running sum  l
        ],
        compiler_params=pltpu.CompilerParams(
            dimension_semantics=("parallel", "arbitrary"),
            vmem_limit_bytes=vmem_limit,
        ),
    )(x_p, prepared_weight)

    emb = emb_p[:B]
    logits = logits_p[:B, :C]
    # Target-logit gather moved out of the kernel (B elements; negligible).
    # NOTE: targets are assumed to lie in [0, n_classes).
    tgt = targets.astype(jnp.int32)[:, None]
    target_logit = jnp.take_along_axis(logits, tgt, axis=1)[:, 0]
    loss = jnp.mean(lse_p[:B, 0] - target_logit)
    return emb, logits, loss


if __name__ == "__main__":
    embedding_size = 32
    n_classes = 8
    batch = 8

    key = jax.random.PRNGKey(0)
    k_x, k_w, k_t = jax.random.split(key, 3)
    inputs = jax.random.normal(k_x, (batch, embedding_size), dtype=jnp.float32)
    # deterministic synthetic classifier weight (concrete subclasses own this
    # parameter; initialized here in-script)
    weight = jax.random.normal(k_w, (n_classes, embedding_size),
                               dtype=jnp.float32) * 0.1
    targets = jax.random.randint(k_t, (batch,), 0, n_classes, dtype=jnp.int32)

    # Cached-parameter path: prepare the bf16 pre-transposed weight once and
    # reuse it across calls (it's a parameter, not an activation).
    _, _, _, c_pad, _, _ = plan_tiles(batch, embedding_size, n_classes)
    w_prepared = prepare_classifier_weight(weight, c_pad)

    emb, logits, loss = metric_learning_loss(
        inputs, weight, targets, n_classes, prepared_weight=w_prepared)
    jax.block_until_ready((emb, logits, loss))

    # quick sanity check against plain JAX (same bf16-matmul / f32-softmax recipe)
    x_n_ref = inputs * jax.lax.rsqrt(
        jnp.maximum(jnp.sum(inputs * inputs, axis=1, keepdims=True), 1e-24))
    ref_logits = jnp.dot(x_n_ref.astype(jnp.bfloat16),
                         weight.astype(jnp.bfloat16).T,
                         preferred_element_type=jnp.float32)
    ref_logp = jax.nn.log_softmax(ref_logits, axis=-1)
    ref_loss = -jnp.mean(jnp.take_along_axis(ref_logp, targets[:, None], axis=1))

    assert jnp.allclose(emb, x_n_ref, atol=1e-5)
    assert jnp.allclose(logits, ref_logits, atol=1e-2)
    assert jnp.allclose(loss, ref_loss, atol=1e-2)

    print("KERNEL_OK")
</pallas_src>

<mosaic_0001>
module attributes {stable_mosaic.version = 11 : i64} {
  func.func @kernel(%arg0: i32, %arg1: i32, %arg2: memref<8x32xf32, #tpu.memory_space<vmem>>, %arg3: memref<32x128xbf16, #tpu.memory_space<vmem>>, %arg4: memref<8x32xf32, #tpu.memory_space<vmem>>, %arg5: memref<8x128xf32, #tpu.memory_space<vmem>>, %arg6: memref<8x1xf32, #tpu.memory_space<vmem>>, %arg7: memref<8x32xbf16, #tpu.memory_space<vmem>>, %arg8: memref<8x1xf32, #tpu.memory_space<vmem>>, %arg9: memref<8x1xf32, #tpu.memory_space<vmem>>) attributes {dimension_semantics = [#tpu.dimension_semantics<parallel>, #tpu.dimension_semantics<arbitrary>], iteration_bounds = array<i64: 1, 1>, scalar_prefetch = 0 : i64, scratch_operands = 3 : i64, tpu.core_type = #tpu.core_type<tc>, window_params = [{transform_indices = @transform_0, window_bounds = array<i64: 8, 32>}, {transform_indices = @transform_1, window_bounds = array<i64: 32, 128>}, {transform_indices = @transform_2, window_bounds = array<i64: 8, 32>}, {transform_indices = @transform_3, window_bounds = array<i64: 8, 128>}, {transform_indices = @transform_4, window_bounds = array<i64: 8, 1>}]} {
    %c0_i32 = arith.constant 0 : i32
    %0 = arith.cmpi eq, %arg1, %c0_i32 : i32
    %1 = arith.extui %0 : i1 to i32
    %c0_i32_0 = arith.constant 0 : i32
    %2 = arith.cmpi ne, %1, %c0_i32_0 : i32
    scf.if %2 {
      %c0_20 = arith.constant 0 : index
      %c0_21 = arith.constant 0 : index
      %37 = vector.load %arg2[%c0_20, %c0_21] : memref<8x32xf32, #tpu.memory_space<vmem>>, vector<8x32xf32>
      %38 = arith.mulf %37, %37 : vector<8x32xf32>
      %cst_22 = arith.constant dense<0.000000e+00> : vector<8xf32>
      %39 = vector.multi_reduction <add>, %38, %cst_22 [1] : vector<8x32xf32> to vector<8xf32>
      %40 = vector.shape_cast %39 : vector<8xf32> to vector<8x1xf32>
      %cst_23 = arith.constant 1.000000e-24 : f32
      %41 = vector.broadcast %cst_23 : f32 to vector<8x1xf32>
      %42 = arith.maximumf %40, %41 : vector<8x1xf32>
      %43 = math.rsqrt %42 : vector<8x1xf32>
      %44 = vector.broadcast %43 : vector<8x1xf32> to vector<8x32xf32>
      %45 = arith.mulf %37, %44 : vector<8x32xf32>
      %c0_24 = arith.constant 0 : index
      %c0_25 = arith.constant 0 : index
      %46 = vector.load %arg4[%c0_24, %c0_25] : memref<8x32xf32, #tpu.memory_space<vmem>>, vector<8x32xf32>
      tpu.vector_store %arg4[%c0_24, %c0_25], %45 {strides = array<i32>} : memref<8x32xf32, #tpu.memory_space<vmem>>, vector<8x32xf32>,
      %47 = arith.truncf %45 : vector<8x32xf32> to vector<8x32xbf16>
      %c0_26 = arith.constant 0 : index
      %c0_27 = arith.constant 0 : index
      %48 = vector.load %arg7[%c0_26, %c0_27] : memref<8x32xbf16, #tpu.memory_space<vmem>>, vector<8x32xbf16>
      tpu.vector_store %arg7[%c0_26, %c0_27], %47 {strides = array<i32>} : memref<8x32xbf16, #tpu.memory_space<vmem>>, vector<8x32xbf16>,
      %cst_28 = arith.constant 0xFF800000 : f32
      %49 = vector.broadcast %cst_28 : f32 to vector<8x1xf32>
      %c0_29 = arith.constant 0 : index
      %c0_30 = arith.constant 0 : index
      %50 = vector.load %arg8[%c0_29, %c0_30] : memref<8x1xf32, #tpu.memory_space<vmem>>, vector<8x1xf32>
      tpu.vector_store %arg8[%c0_29, %c0_30], %49 {strides = array<i32>} : memref<8x1xf32, #tpu.memory_space<vmem>>, vector<8x1xf32>,
      %cst_31 = arith.constant 0.000000e+00 : f32
      %51 = vector.broadcast %cst_31 : f32 to vector<8x1xf32>
      %c0_32 = arith.constant 0 : index
      %c0_33 = arith.constant 0 : index
      %52 = vector.load %arg9[%c0_32, %c0_33] : memref<8x1xf32, #tpu.memory_space<vmem>>, vector<8x1xf32>
      tpu.vector_store %arg9[%c0_32, %c0_33], %51 {strides = array<i32>} : memref<8x1xf32, #tpu.memory_space<vmem>>, vector<8x1xf32>,
    } else {
    }
    %c0 = arith.constant 0 : index
    %c0_1 = arith.constant 0 : index
    %3 = vector.load %arg7[%c0, %c0_1] : memref<8x32xbf16, #tpu.memory_space<vmem>>, vector<8x32xbf16>
    %c0_2 = arith.constant 0 : index
    %c0_3 = arith.constant 0 : index
    %4 = vector.load %arg3[%c0_2, %c0_3] : memref<32x128xbf16, #tpu.memory_space<vmem>>, vector<32x128xbf16>
    %cst = arith.constant dense<0.000000e+00> : vector<8x128xf32>
    %5 = tpu.matmul %3, %4, %cst {dimension_numbers = #tpu.dot_dimension_numbers<[1], [0], [0], [1], [0, 0, 1, 1], [], []>} : vector<8x32xbf16>, vector<32x128xbf16>, vector<8x128xf32> -> vector<8x128xf32>
    %c0_4 = arith.constant 0 : index
    %c0_5 = arith.constant 0 : index
    %6 = vector.load %arg5[%c0_4, %c0_5] : memref<8x128xf32, #tpu.memory_space<vmem>>, vector<8x128xf32>
    tpu.vector_store %arg5[%c0_4, %c0_5], %5 {strides = array<i32>} : memref<8x128xf32, #tpu.memory_space<vmem>>, vector<8x128xf32>,
    %c128_i32 = arith.constant 128 : i32
    %7 = arith.muli %arg1, %c128_i32 : i32
    %8 = tpu.iota {dimensions = array<i32: 1>} : vector<1x128xi32>
    %9 = vector.broadcast %7 : i32 to vector<1x128xi32>
    %10 = arith.addi %9, %8 : vector<1x128xi32>
    %c8_i32 = arith.constant 8 : i32
    %11 = vector.broadcast %c8_i32 : i32 to vector<1x128xi32>
    %12 = arith.cmpi slt, %10, %11 : vector<1x128xi32>
    %cst_6 = arith.constant 0.000000e+00 : f32
    %cst_7 = arith.constant 0xFF800000 : f32
    %13 = vector.broadcast %cst_6 : f32 to vector<1x128xf32>
    %14 = vector.broadcast %cst_7 : f32 to vector<1x128xf32>
    %15 = arith.select %12, %13, %14 : vector<1x128xi1>, vector<1x128xf32>
    %16 = vector.broadcast %15 : vector<1x128xf32> to vector<8x128xf32>
    %17 = arith.addf %5, %16 : vector<8x128xf32>
    %c0_8 = arith.constant 0 : index
    %c0_9 = arith.constant 0 : index
    %18 = vector.load %arg8[%c0_8, %c0_9] : memref<8x1xf32, #tpu.memory_space<vmem>>, vector<8x1xf32>
    %cst_10 = arith.constant dense<0xFF800000> : vector<8xf32>
    %19 = vector.multi_reduction <maximumf>, %17, %cst_10 [1] : vector<8x128xf32> to vector<8xf32>
    %20 = vector.shape_cast %19 : vector<8xf32> to vector<8x1xf32>
    %21 = arith.maximumf %18, %20 : vector<8x1xf32>
    %22 = arith.subf %18, %21 : vector<8x1xf32>
    %23 = math.exp %22 : vector<8x1xf32>
    %c0_11 = arith.constant 0 : index
    %c0_12 = arith.constant 0 : index
    %24 = vector.load %arg9[%c0_11, %c0_12] : memref<8x1xf32, #tpu.memory_space<vmem>>, vector<8x1xf32>
    %25 = arith.mulf %23, %24 : vector<8x1xf32>
    %26 = vector.broadcast %21 : vector<8x1xf32> to vector<8x128xf32>
    %27 = arith.subf %17, %26 : vector<8x128xf32>
    %28 = math.exp %27 : vector<8x128xf32>
    %cst_13 = arith.constant dense<0.000000e+00> : vector<8xf32>
    %29 = vector.multi_reduction <add>, %28, %cst_13 [1] : vector<8x128xf32> to vector<8xf32>
    %30 = vector.shape_cast %29 : vector<8xf32> to vector<8x1xf32>
    %31 = arith.addf %25, %30 : vector<8x1xf32>
    %c0_14 = arith.constant 0 : index
    %c0_15 = arith.constant 0 : index
    %32 = vector.load %arg9[%c0_14, %c0_15] : memref<8x1xf32, #tpu.memory_space<vmem>>, vector<8x1xf32>
    tpu.vector_store %arg9[%c0_14, %c0_15], %31 {strides = array<i32>} : memref<8x1xf32, #tpu.memory_space<vmem>>, vector<8x1xf32>,
    %c0_16 = arith.constant 0 : index
    %c0_17 = arith.constant 0 : index
    %33 = vector.load %arg8[%c0_16, %c0_17] : memref<8x1xf32, #tpu.memory_space<vmem>>, vector<8x1xf32>
    tpu.vector_store %arg8[%c0_16, %c0_17], %21 {strides = array<i32>} : memref<8x1xf32, #tpu.memory_space<vmem>>, vector<8x1xf32>,
    %c0_i32_18 = arith.constant 0 : i32
    %34 = arith.cmpi eq, %arg1, %c0_i32_18 : i32
    %35 = arith.extui %34 : i1 to i32
    %c0_i32_19 = arith.constant 0 : i32
    %36 = arith.cmpi ne, %35, %c0_i32_19 : i32
    scf.if %36 {
      %c0_20 = arith.constant 0 : index
      %c0_21 = arith.constant 0 : index
      %37 = vector.load %arg8[%c0_20, %c0_21] : memref<8x1xf32, #tpu.memory_space<vmem>>, vector<8x1xf32>
      %c0_22 = arith.constant 0 : index
      %c0_23 = arith.constant 0 : index
      %38 = vector.load %arg9[%c0_22, %c0_23] : memref<8x1xf32, #tpu.memory_space<vmem>>, vector<8x1xf32>
      %39 = math.log %38 : vector<8x1xf32>
      %40 = arith.addf %37, %39 : vector<8x1xf32>
      %c0_24 = arith.constant 0 : index
      %c0_25 = arith.constant 0 : index
      %41 = vector.load %arg6[%c0_24, %c0_25] : memref<8x1xf32, #tpu.memory_space<vmem>>, vector<8x1xf32>
      tpu.vector_store %arg6[%c0_24, %c0_25], %40 {strides = array<i32>} : memref<8x1xf32, #tpu.memory_space<vmem>>, vector<8x1xf32>,
    } else {
    }
    return
  }
  func.func @transform_0(%arg0: i32, %arg1: i32) -> (i32, i32) {
    %c0_i32 = arith.constant 0 : i32
    %c0_i32_0 = arith.constant 0 : i32
    return %arg0, %c0_i32 : i32, i32
  }
  func.func @transform_1(%arg0: i32, %arg1: i32) -> (i32, i32) {
    %c0_i32 = arith.constant 0 : i32
    %c0_i32_0 = arith.constant 0 : i32
    return %c0_i32, %arg1 : i32, i32
  }
  func.func @transform_2(%arg0: i32, %arg1: i32) -> (i32, i32) {
    %c0_i32 = arith.constant 0 : i32
    %c0_i32_0 = arith.constant 0 : i32
    return %arg0, %c0_i32 : i32, i32
  }
  func.func @transform_3(%arg0: i32, %arg1: i32) -> (i32, i32) {
    %c0_i32 = arith.constant 0 : i32
    return %arg0, %arg1 : i32, i32
  }
  func.func @transform_4(%arg0: i32, %arg1: i32) -> (i32, i32) {
    %c0_i32 = arith.constant 0 : i32
    %c0_i32_0 = arith.constant 0 : i32
    return %arg0, %c0_i32 : i32, i32
  }
}

</mosaic_0001>

<bundles_post_ra>
// kernel: tpu_custom_call.1
= control target key start
LH: loop header
LB: loop body
LE: loop exit
PB: predicated region body
PF: predicated region fallthrough
CT: control target
= control target key end

     0   :  { %10 = vsyncpa [#allocation6], 0  ;;  %s432_s0 = inlined_call_operand.hbm [shape: f32[8,32], index: 0, kind: input, shape index: {}]   ;;  %s433_s1 = inlined_call_operand.hbm [shape: bf16[32,128], index: 1, kind: input, shape index: {}]   ;;  %s434_s2 = inlined_call_operand.hbm [shape: f32[8,32], index: 2, kind: output, shape index: {0}]   ;;  %s435_s3 = inlined_call_operand.hbm [shape: f32[8,128], index: 3, kind: output, shape index: {1}]   ;;  %s436_s4 = inlined_call_operand.vmem [shape: f32[8,1], index: 4, kind: output, shape index: {2}]  }
   0x1   :  { %11 = vsyncpa [#allocation9], 0 }
   0x2   :  { %12 = vsyncpa [#allocation7], 0 }
   0x3   :  { %13 = vsyncpa [#allocation12], 0  ;;  %s331_s15 = smov [#allocation5]   ;;  %s332_s17 = smov [#allocation8]  }
   0x4   :  { %s20_s16 = sshll.u32 %s331_s15, 4  ;;  %s29_s18 = sshll.u32 %s332_s17, 4  ;;  %s21_s16 = int_to_ptr.vmem [resolvable:$true] %s20_s16  ;;  %s366_s18 = int_to_ptr.vmem [resolvable:$true] %s29_s18 }
   0x5   :  { %s235_s21 = scalar_lea.hbm %s432_s0, 128 }
   0x6   :  { %p236_p0 = scmp.ne.s32.totalorder %s432_s0, %s235_s21  ;;  %p239_p1 = scmp.lt.u32.totalorder %s235_s21, %s432_s0 }
   0x8   :  { %p241_p2 = pnand %p239_p1, %p236_p0 }
   0xa   :  { %244 = shalt.err (!%p241_p2)
}
   0xb   :  { %s245_s26 = scalar_lea.vmem %s21_s16, 128  ;;  %p250_p4 = scmp.lt.s32.totalorder %s21_s16, %s21_s16 }
   0xc   :  { %p246_p3 = scmp.ne.s32.totalorder %s21_s16, %s245_s26  ;;  %p251_p5 = scmp.lt.s32.totalorder %s245_s26, %s245_s26 }
   0xe   :  { %p252_p6 = por %p251_p5, %p250_p4 }
  0x10   :  { %p253_p7 = pnand %p252_p6, %p246_p3 }
  0x12   :  { %256 = shalt.err (!%p253_p7)
}
  0x13   :  { %23 = dma.hbm_to_vmem [thread:$0]  %s432_s0, 128, %s21_s16, [#allocation6]  }
  0x14   :  { %s257_s5 = scalar_lea.hbm %s433_s1, 256 }
  0x15   :  { %p258_p8 = scmp.ne.s32.totalorder %s433_s1, %s257_s5  ;;  %p261_p9 = scmp.lt.u32.totalorder %s257_s5, %s433_s1 }
  0x17   :  { %p263_p10 = pnand %p261_p9, %p258_p8 }
  0x19   :  { %266 = shalt.err (!%p263_p10)
}
  0x1a   :  { %s267_s10 = scalar_lea.vmem %s366_s18, 256  ;;  %p272_p12 = scmp.lt.s32.totalorder %s366_s18, %s366_s18 }
  0x1b   :  { %p268_p11 = scmp.ne.s32.totalorder %s366_s18, %s267_s10  ;;  %p273_p13 = scmp.lt.s32.totalorder %s267_s10, %s267_s10 }
  0x1d   :  { %p274_p0 = por %p273_p13, %p272_p12 }
  0x1f   :  { %p275_p1 = pnand %p274_p0, %p268_p11 }
  0x21   :  { %278 = shalt.err (!%p275_p1)
}
  0x22   :  { %s333_s0 = smov 64   ;;  %s334_s11 = smov 4  }
  0x23   :  { %35 = dma.hbm_to_vmem [thread:$0]  %s433_s1, 256, %s366_s18, [#allocation9], %s333_s0, %s333_s0, %s334_s11  }
  0x24   :  { %323 = dma.done.wait [#allocation6], 128  }
  0x25   :  { %324 = vsyncadd [#allocation6], 4294967168 }
  0x26   :  { %325 = dma.done.wait [#allocation9], 256  }
  0x27   :  { %326 = vsyncadd [#allocation9], 4294967040  ;;  %v47_v0 = vld [vmem:[#allocation5] sm:$0xff]  ;;  %vm49_vm0 = vcmask 261120   ;;  %v225_v3 = vld [vmem:[#allocation8] sm:$0xff]   ;;  %vm60_vm1 = vcmask 7168   ;;  %v126_v13 = vlaneseq }
  0x28   :  { %v48_v1 = vmul.f32 %v47_v0, %v47_v0  ;;  %v335_v4 = vmov 0.0   ;;  %v226_v5 = vld [vmem:[#allocation8 + $0x8] sm:$0xff]   ;;  %vm336_vm2 = vmmov 0   ;;  %vm58_vm3 = vcmask 257024   ;;  %s339_s1 = smov [#allocation10]   ;;  %s340_s15 = smov [#allocation11]  }
  0x29   :  { %205 = vmatprep.subr.bf16.mxu0 %v335_v4  ;;  %62 = vst.msk [vmem:[#allocation4] sm:$0xff] %vm60_vm1, %v335_v4  ;;  %209 = vmatprep.mubr.msk.bf16.mxu0 %vm336_vm2, %v335_v4  ;;  %v337_v12 = vmov -inf   ;;  %v127_v14 = vand.u32 127, %v126_v13  ;;  %v338_v21 = vmov 0   ;;  %s171_s14 = sshll.u32 %s339_s1, 4  ;;  %s181_s16 = sshll.u32 %s340_s15, 4  ;;  %s172_s14 = int_to_ptr.vmem [resolvable:$true] %s171_s14  ;;  %s182_s16 = int_to_ptr.vmem [resolvable:$true] %s181_s16 }
  0x2a   :  { %v50_v2 = vsel %vm49_vm0, %v48_v1, 0.0  ;;  %206 = vmatpush3.bf16.msra.mxu0 %v225_v3  ;;  %61 = vst.msk [vmem:[#allocation3] sm:$0xff] %vm60_vm1, %v337_v12  ;;  %223 = vset.pattern.permute.xlu1 %v338_v21  ;;  %s279_s17 = scalar_lea.vmem %s172_s14, 128  ;;  %p284_p3 = scmp.lt.s32.totalorder %s172_s14, %s172_s14 }
  0x2b   :  { %51 = vadd.xlane.f32.xlu0 %v50_v2  ;;  %207 = vmatprep.subr.bf16.mxu0 %v335_v4  ;;  %vm130_vm4 = vcmp.lt.s32.totalorder %v127_v14, 8  ;;  %p280_p2 = scmp.ne.s32.totalorder %s172_s14, %s279_s17  ;;  %p285_p4 = scmp.lt.s32.totalorder %s279_s17, %s279_s17 }
  0x2c   :  { %v131_v15 = vsel %vm130_vm4, 0.0, %v337_v12  ;;  %224 = vset.pattern.permute.xlu0 %v338_v21 }
  0x2d   :  { %p286_p5 = por %p285_p4, %p284_p3 }
  0x2e   :  { %208 = vmatpush3.bf16.msra.mxu0 %v226_v5 }
  0x2f   :  { %p287_p6 = pnand %p286_p5, %p280_p2 }
  0x31   :  { %v133_v22 = vld [vmem:[#allocation3] sm:$0xff] }
  0xb8   :  { %v52_v6 = vpop.xlane.xlu0 %51 }
  0xb9   :  { %v53_v7 = vmax.f32 %v52_v6, 1e-24 }
  0xbb   :  { %227 = vrsqrt.f32 %v53_v7 }
  0xc5   :  { %v228_v8 = vpop.eup %227 }
  0xc6   :  { %v55_v9 = vmul.f32 %v228_v8, %v47_v0 }
  0xc8   :  { %v57_v10 = vpack.c.bf16 %v55_v9, %v55_v9  ;;  %56 = vst.msk [vmem:[#allocation10] sm:$0xff] %vm49_vm0, %v55_v9 }
  0xca   :  { %59 = vst.msk [vmem:[#allocation2] sm:$0xf] %vm58_vm3, %v57_v10 }
  0xd1   :  { %v63_v11 = vld [vmem:[#allocation2] sm:$0xf] }
  0xd2   :  { %210 = vmatmul.mubr.msk.bf16.vlgmr.msra.gmra.mrb[0].mxu0 %vm49_vm0, %v63_v11 }
 0x1a5   :  { %v118_v16 = vpop.f32.mrb[0].mxu0 }
 0x1a6   :  { %124 = vst [vmem:[#allocation11] sm:$0xff] %v118_v16  ;;  %v211_v17 = vpop.f32.mrb[1].mxu0  ;;  %v132_v18 = vadd.f32 %v131_v15, %v118_v16 }
 0x1a7   :  { %v121_v19 = vpop.f32.mrb[2].mxu0 }
 0x1a8   :  { %134 = vmax.xlane.f32.xlu0 %v132_v18  ;;  %v212_v20 = vpop.f32.mrb[3].mxu0 }
 0x235   :  { %v135_v23 = vpop.xlane.xlu0 %134 }
 0x236   :  { %v136_v24 = vmax.f32 %v133_v22, %v135_v23 }
 0x238   :  { %v137_v25 = vsub.f32 %v133_v22, %v136_v24  ;;  %155 = vst.msk [vmem:[#allocation3] sm:$0xff] %vm60_vm1, %v136_v24  ;;  %144 = vperm.xlu1 %223, %v136_v24  }
 0x2b7   :  { %v145_v26 = vpop.permute.xlu1 %144 }
 0x2b8   :  { %v147_v27 = vsub.f32 %v132_v18, %v145_v26 }
 0x2ba   :  { %v148_v28 = vmul.f32 1.442695, %v147_v27 }
 0x2bc   :  { %229 = vpow2.f32 %v148_v28 }
 0x2c6   :  { %v230_v29 = vpop.eup %229 }
 0x2c7   :  { %150 = vadd.xlane.f32.xlu1 %v230_v29 }
 0x2c8   :  { %290 = shalt.err (!%p287_p6)
}
 0x2c9   :  { %s291_s20 = scalar_lea.hbm %s434_s2, 128 }
 0x2ca   :  { %p292_p7 = scmp.ne.s32.totalorder %s434_s2, %s291_s20  ;;  %p295_p8 = scmp.lt.u32.totalorder %s291_s20, %s434_s2 }
 0x2cc   :  { %p297_p9 = pnand %p295_p8, %p292_p7 }
 0x2ce   :  { %300 = shalt.err (!%p297_p9)
}
 0x2cf   :  { %174 = dma.vmem_to_hbm [thread:$0]  %s172_s14, 128, %s434_s2, [#allocation7]  }
 0x2d0   :  { %s301_s27 = scalar_lea.vmem %s182_s16, 128  ;;  %p306_p11 = scmp.lt.s32.totalorder %s182_s16, %s182_s16 }
 0x2d1   :  { %p302_p10 = scmp.ne.s32.totalorder %s182_s16, %s301_s27  ;;  %p307_p12 = scmp.lt.s32.totalorder %s301_s27, %s301_s27 }
 0x2d3   :  { %p308_p13 = por %p307_p12, %p306_p11 }
 0x2d5   :  { %p309_p0 = pnand %p308_p13, %p302_p10 }
 0x2d7   :  { %312 = shalt.err (!%p309_p0)
}
 0x2d8   :  { %s313_s30 = scalar_lea.hbm %s435_s3, 128 }
 0x2d9   :  { %p314_p1 = scmp.ne.s32.totalorder %s435_s3, %s313_s30  ;;  %p317_p2 = scmp.lt.u32.totalorder %s313_s30, %s435_s3 }
 0x2db   :  { %p319_p3 = pnand %p317_p2, %p314_p1 }
 0x2dd   :  { %322 = shalt.err (!%p319_p3)
}
 0x2de   :  { %184 = dma.vmem_to_hbm [thread:$0]  %s182_s16, 128, %s435_s3, [#allocation12]   ;;  %v138_v30 = vmul.f32 1.442695, %v137_v25  ;;  %v140_v32 = vld [vmem:[#allocation4] sm:$0xff]  ;;  %v159_v39 = vld [vmem:[#allocation3] sm:$0xff] }
 0x2e0   :  { %231 = vpow2.f32 %v138_v30 }
 0x2ea   :  { %v232_v31 = vpop.eup %231 }
 0x2eb   :  { %v141_v33 = vmul.f32 %v232_v31, %v140_v32 }
 0x354   :  { %v151_v34 = vpop.xlane.xlu1 %150 }
 0x355   :  { %v152_v35 = vadd.f32 %v151_v34, %v141_v33 }
 0x357   :  { %154 = vst.msk [vmem:[#allocation4] sm:$0xff] %vm60_vm1, %v152_v35 }
 0x35e   :  { %v160_v36 = vld [vmem:[#allocation4] sm:$0xff] }
 0x35f   :  { %233 = vlog2.f32 %v160_v36 }
 0x369   :  { %v234_v37 = vpop.eup %233 }
 0x36a   :  { %v162_v38 = vmul.f32 0.6931472, %v234_v37 }
 0x36c   :  { %v163_v40 = vadd.f32 %v162_v38, %v159_v39 }
 0x36e   :  { %164 = vst.msk [vmem:[%s436_s4] sm:$0xff] %vm60_vm1, %v163_v40 }
 0x36f   :  { %327 = dma.done.wait [#allocation7], 128  }
 0x370   :  { %328 = vsyncadd [#allocation7], 4294967168 }
 0x371   :  { %329 = dma.done.wait [#allocation12], 128  }
 0x372   :  { %330 = vsyncadd [#allocation12], 4294967168 }
 0x373   :  { %195 = vsyncpa [#allocation6], 1 }
 0x374   :  { %196 = vsyncpa [#allocation9], 1 }
 0x375   :  { %197 = vsyncpa [#allocation7], 1 }
 0x376   :  { %198 = vsyncpa [#allocation12], 1 }

</bundles_post_ra>
